<compile_context>
chip_gen: v7x
topology: tpu7x:2x2x1
jax: 0.10.0
libtpu: 0.0.40
codegen_flags: <defaults>
</compile_context>

<pallas_src>
import jax
import jax.numpy as jnp
from jax.experimental import pallas as pl
from jax.experimental.pallas import tpu as pltpu


def _se_kernel(x_ref, w1_ref, w2_ref, o_ref):
    # x_ref block: (1, C, HW); w1: (C_r, C); w2: (C, C_r).
    x = x_ref[0]                                                   # (C, HW), native dtype
    hw = x.shape[-1]

    # --- Squeeze: global average pool over the spatial (lane) axis, f32 accumulation.
    pooled = jnp.sum(x.astype(jnp.float32), axis=-1, keepdims=True) * (1.0 / hw)  # (C, 1)

    # --- Excite: FC1 -> ReLU -> FC2 -> hard-sigmoid (relu6(z + 3) / 6).
    # Column-vector matvecs: LHS contracts along lanes, RHS along sublanes -> the
    # natural MXU layout; result (.., 1) broadcasts straight back onto x's rows.
    w1 = w1_ref[...].astype(jnp.float32)                           # (C_r, C)
    w2 = w2_ref[...].astype(jnp.float32)                           # (C, C_r)
    h = jnp.maximum(
        jnp.dot(w1, pooled, preferred_element_type=jnp.float32), 0.0)  # (C_r, 1)
    z = jnp.dot(w2, h, preferred_element_type=jnp.float32)             # (C, 1)
    gate = jnp.clip(z + 3.0, 0.0, 6.0) * (1.0 / 6.0)                    # (C, 1)

    # --- Scale the resident activation tile and write back once (lane-dense store).
    o_ref[0] = (x * gate.astype(x.dtype)).astype(o_ref.dtype)


def se_module(x: jax.Array, w1: jax.Array, w2: jax.Array) -> jax.Array:
    """SEModule forward. x: (B, C, H, W); w1: (C//r, C); w2: (C, C//r)."""
    B, C, H, W = x.shape
    Cr = w1.shape[0]
    assert w1.shape == (Cr, C) and w2.shape == (C, Cr), (w1.shape, w2.shape)
    HW = H * W

    # Contiguous NCHW -> (B, C, H*W) is a metadata-only reshape (no copy).
    x3 = x.reshape(B, C, HW)

    out3 = pl.pallas_call(
        _se_kernel,
        out_shape=jax.ShapeDtypeStruct((B, C, HW), x.dtype),
        grid_spec=pltpu.PrefetchScalarGridSpec(
            num_scalar_prefetch=0,
            grid=(B,),
            in_specs=[
                # Full (C, HW) tile per sample; full-extent trailing dims are exempt
                # from the (8, 128) divisibility rule.  Largest MobileNetV3 SE tiles
                # are well under 1 MiB, so double-buffering fits scoped VMEM easily.
                pl.BlockSpec((1, C, HW), lambda b: (b, 0, 0)),
                # Weights: constant block index -> VMEM-resident, no per-step re-DMA.
                pl.BlockSpec((Cr, C), lambda b: (0, 0)),
                pl.BlockSpec((C, Cr), lambda b: (0, 0)),
            ],
            out_specs=pl.BlockSpec((1, C, HW), lambda b: (b, 0, 0)),
        ),
        compiler_params=pltpu.CompilerParams(
            dimension_semantics=("parallel",),
        ),
    )(x3, w1, w2)

    return out3.reshape(B, C, H, W)


def _se_ref(x, w1, w2):
    # Pure-JAX reference matching the PyTorch SEModule.
    y = jnp.mean(x, axis=(2, 3))                       # (B, C)
    y = jnp.maximum(y @ w1.T, 0.0)                     # (B, C_r)
    y = y @ w2.T                                       # (B, C)
    y = jnp.clip(y + 3.0, 0.0, 6.0) / 6.0              # hsigmoid
    return x * y[:, :, None, None]


if __name__ == "__main__":
    key = jax.random.PRNGKey(0)
    kx, k1, k2 = jax.random.split(key, 3)

    # Small shapes consistent with a MobileNetV3 SE block: B=2, C=16, 16x16 spatial, r=4.
    B, C, H, W = 2, 16, 16, 16
    reduction = 4
    Cr = C // reduction

    x = jax.random.normal(kx, (B, C, H, W), dtype=jnp.float32)
    w1 = 0.3 * jax.random.normal(k1, (Cr, C), dtype=jnp.float32)   # Linear(C -> C/r).weight
    w2 = 0.3 * jax.random.normal(k2, (C, Cr), dtype=jnp.float32)   # Linear(C/r -> C).weight

    se_fwd = jax.jit(se_module)
    y = se_fwd(x, w1, w2)
    jax.block_until_ready(y)

    y_ref = _se_ref(x, w1, w2)

    assert y.shape == x.shape, (y.shape, x.shape)
    assert y.dtype == x.dtype, (y.dtype, x.dtype)
    max_err = float(jnp.max(jnp.abs(y - y_ref)))
    assert jnp.allclose(y, y_ref, atol=1e-5, rtol=1e-5), f"max abs err {max_err}"

    print("KERNEL_OK")
</pallas_src>

<mosaic_0001>
module attributes {stable_mosaic.version = 11 : i64} {
  func.func @_se_kernel(%arg0: i32, %arg1: memref<1x16x256xf32, #tpu.memory_space<vmem>>, %arg2: memref<4x16xf32, #tpu.memory_space<vmem>>, %arg3: memref<16x4xf32, #tpu.memory_space<vmem>>, %arg4: memref<1x16x256xf32, #tpu.memory_space<vmem>>) attributes {dimension_semantics = [#tpu.dimension_semantics<parallel>], iteration_bounds = array<i64: 2>, scalar_prefetch = 0 : i64, scratch_operands = 0 : i64, tpu.core_type = #tpu.core_type<tc>, window_params = [{transform_indices = @transform_0, window_bounds = array<i64: 1, 16, 256>}, {pipeline_mode = #tpu.pipeline_mode<synchronous>, transform_indices = @transform_1, window_bounds = array<i64: 4, 16>}, {pipeline_mode = #tpu.pipeline_mode<synchronous>, transform_indices = @transform_2, window_bounds = array<i64: 16, 4>}, {transform_indices = @transform_3, window_bounds = array<i64: 1, 16, 256>}]} {
    %c0 = arith.constant 0 : index
    %c0_0 = arith.constant 0 : index
    %c0_1 = arith.constant 0 : index
    %0 = vector.load %arg1[%c0, %c0_0, %c0_1] : memref<1x16x256xf32, #tpu.memory_space<vmem>>, vector<1x16x256xf32>
    %1 = vector.shape_cast %0 : vector<1x16x256xf32> to vector<16x256xf32>
    %cst = arith.constant dense<0.000000e+00> : vector<16xf32>
    %2 = vector.multi_reduction <add>, %1, %cst [1] : vector<16x256xf32> to vector<16xf32>
    %3 = vector.shape_cast %2 : vector<16xf32> to vector<16x1xf32>
    %cst_2 = arith.constant 3.906250e-03 : f32
    %4 = vector.broadcast %cst_2 : f32 to vector<16x1xf32>
    %5 = arith.mulf %3, %4 : vector<16x1xf32>
    %c0_3 = arith.constant 0 : index
    %c0_4 = arith.constant 0 : index
    %6 = vector.load %arg2[%c0_3, %c0_4] : memref<4x16xf32, #tpu.memory_space<vmem>>, vector<4x16xf32>
    %c0_5 = arith.constant 0 : index
    %c0_6 = arith.constant 0 : index
    %7 = vector.load %arg3[%c0_5, %c0_6] : memref<16x4xf32, #tpu.memory_space<vmem>>, vector<16x4xf32>
    %cst_7 = arith.constant dense<0.000000e+00> : vector<4x1xf32>
    %8 = tpu.matmul %6, %5, %cst_7 {dimension_numbers = #tpu.dot_dimension_numbers<[1], [0], [0], [1], [0, 0, 1, 1], [], []>} : vector<4x16xf32>, vector<16x1xf32>, vector<4x1xf32> -> vector<4x1xf32>
    %cst_8 = arith.constant 0.000000e+00 : f32
    %9 = vector.broadcast %cst_8 : f32 to vector<4x1xf32>
    %10 = arith.maximumf %8, %9 : vector<4x1xf32>
    %cst_9 = arith.constant dense<0.000000e+00> : vector<16x1xf32>
    %11 = tpu.matmul %7, %10, %cst_9 {dimension_numbers = #tpu.dot_dimension_numbers<[1], [0], [0], [1], [0, 0, 1, 1], [], []>} : vector<16x4xf32>, vector<4x1xf32>, vector<16x1xf32> -> vector<16x1xf32>
    %cst_10 = arith.constant 3.000000e+00 : f32
    %12 = vector.broadcast %cst_10 : f32 to vector<16x1xf32>
    %13 = arith.addf %11, %12 : vector<16x1xf32>
    %cst_11 = arith.constant 0.000000e+00 : f32
    %cst_12 = arith.constant 6.000000e+00 : f32
    %14 = vector.broadcast %cst_11 : f32 to vector<16x1xf32>
    %15 = arith.maximumf %14, %13 : vector<16x1xf32>
    %16 = vector.broadcast %cst_12 : f32 to vector<16x1xf32>
    %17 = arith.minimumf %16, %15 : vector<16x1xf32>
    %cst_13 = arith.constant 0.166666672 : f32
    %18 = vector.broadcast %cst_13 : f32 to vector<16x1xf32>
    %19 = arith.mulf %17, %18 : vector<16x1xf32>
    %20 = vector.broadcast %19 : vector<16x1xf32> to vector<16x256xf32>
    %21 = arith.mulf %1, %20 : vector<16x256xf32>
    %c0_14 = arith.constant 0 : index
    %c0_15 = arith.constant 0 : index
    %c0_16 = arith.constant 0 : index
    %22 = vector.load %arg4[%c0_14, %c0_15, %c0_16] : memref<1x16x256xf32, #tpu.memory_space<vmem>>, vector<1x16x256xf32>
    %23 = vector.shape_cast %22 : vector<1x16x256xf32> to vector<16x256xf32>
    %24 = vector.shape_cast %21 : vector<16x256xf32> to vector<1x16x256xf32>
    tpu.vector_store %arg4[%c0_14, %c0_15, %c0_16], %24 {strides = array<i32>} : memref<1x16x256xf32, #tpu.memory_space<vmem>>, vector<1x16x256xf32>,
    return
  }
  func.func @transform_0(%arg0: i32) -> (i32, i32, i32) {
    %c0_i32 = arith.constant 0 : i32
    %c0_i32_0 = arith.constant 0 : i32
    %c0_i32_1 = arith.constant 0 : i32
    return %arg0, %c0_i32, %c0_i32_0 : i32, i32, i32
  }
  func.func @transform_1(%arg0: i32) -> (i32, i32) {
    %c0_i32 = arith.constant 0 : i32
    %c0_i32_0 = arith.constant 0 : i32
    %c0_i32_1 = arith.constant 0 : i32
    return %c0_i32, %c0_i32_0 : i32, i32
  }
  func.func @transform_2(%arg0: i32) -> (i32, i32) {
    %c0_i32 = arith.constant 0 : i32
    %c0_i32_0 = arith.constant 0 : i32
    %c0_i32_1 = arith.constant 0 : i32
    return %c0_i32, %c0_i32_0 : i32, i32
  }
  func.func @transform_3(%arg0: i32) -> (i32, i32, i32) {
    %c0_i32 = arith.constant 0 : i32
    %c0_i32_0 = arith.constant 0 : i32
    %c0_i32_1 = arith.constant 0 : i32
    return %arg0, %c0_i32, %c0_i32_0 : i32, i32, i32
  }
}

</mosaic_0001>

<bundles_post_ra>
// kernel: se_module.1
= control target key start
LH: loop header
LB: loop body
LE: loop exit
PB: predicated region body
PF: predicated region fallthrough
CT: control target
= control target key end

     0   :  { %s510_s12 = smov 0   ;;  %s543_s0 = inlined_call_operand.vmem [shape: f32[2,16,256], index: 0, kind: input, shape index: {}]   ;;  %s544_s1 = inlined_call_operand.vmem [shape: f32[4,16], index: 1, kind: input, shape index: {}]   ;;  %s545_s2 = inlined_call_operand.vmem [shape: f32[16,4], index: 2, kind: input, shape index: {}]   ;;  %s546_s3 = inlined_call_operand.vmem [shape: f32[2,16,256], index: 3, kind: output, shape index: {}]  }
   0x1 LB: > { %s426_s13 = sadd.s32 4294967295, %s484_s12   ;;  %p430_p0 = scmp.ge.s32.totalorder %s484_s12, 1  ;;  %s484_s12 = sphi %s510_s12, %s13_s12  }
   0x2   : > { %p137_p1 = scmp.lt.s32.totalorder %s484_s12, 3 }
   0x4   : > { %p138_p2 = pnand %p430_p0, %p137_p1 }
   0x5   : > { %p161_p3 = scmp.lt.s32.totalorder (!%p138_p2), %s426_s13, 1  ;;  %v486_v6 = vmov (!%p138_p2), 0.0|0.0   ;;  %vm487_vm0 = vmmov (!%p138_p2), 0   ;;  %v488_v7 = vmov (!%p138_p2), 0.0   ;;  %v183_v13 = vld [vmem:[%s544_s1] sm:$0xf] (!%p138_p2) }
   0x6   : > { %141 = sbr.rel (%p138_p2) target bundleno = 744 (0x2e8), region = 32  ;;  %461 = vmatprep.subr.bf16.mxu0 (!%p138_p2), %v486_v6  ;;  %453 = vmatprep.mubr.msk.f32.mxu0 (!%p138_p2), %vm487_vm0, %v488_v7  ;;  %vm186_vm1 = vcmask (!%p138_p2), 130048   ;;  %v184_v14 = vld [vmem:[%s545_s2] sm:$0xff] (!%p138_p2)  ;;  %vm261_vm2 = vcmask (!%p138_p2), 31744   ;;  %vm268_vm3 = vcmask (!%p138_p2), 1043456   ;;  %v185_v18 = vld [vmem:[%s545_s2 + $0x8] sm:$0xff] (!%p138_p2) }
   0x7   : > { %458 = vmatprep.mubr.msk.f32.mxu1 (!%p138_p2), %vm261_vm2, %v184_v14  ;;  %v489_v19 = vmov (!%p138_p2), 0  }
   0x8   : > { %476 = vset.pattern.permute.xlu1 (!%p138_p2), %v489_v19  ;;  %477 = vset.pattern.permute.xlu0 (!%p138_p2), %v489_v19 }
   0xd   : > { %s548_s13 = smov (!%p161_p3, %s426_s13), 1 }
   0xe   : > { %s441_s14 = sshll.u32 %s548_s13, 5 }
   0xf   : > { %s165_s17 = scalar_lea.vmem %s543_s0, %s441_s14  ;;  %s170_s26 = scalar_lea.vmem %s546_s3, %s441_s14 }
  0x10   : > { %v171_v0 = vld [vmem:[%s165_s17] sm:$0xff]  ;;  %v172_v1 = vld [vmem:[%s165_s17 + $0x8] sm:$0xff]  ;;  %v173_v2 = vld [vmem:[%s165_s17 + $0x10] sm:$0xff] }
  0x11   : > { %v175_v3 = vadd.f32 %v172_v1, %v171_v0  ;;  %v174_v4 = vld [vmem:[%s165_s17 + $0x18] sm:$0xff] }
  0x12   : > { %v178_v5 = vadd.f32 %v174_v4, %v173_v2 }
  0x13   : > { %176 = vadd.xlane.f32.xlu0 %v175_v3 }
  0x17   : > { %179 = vadd.xlane.f32.xlu0 %v178_v5 }
  0xa0   : > { %v177_v8 = vpop.xlane.xlu0 %176 }
  0xa1   : > { %v181_v10 = vmul.f32 0.00390625, %v177_v8 }
  0xa4   : > { %v180_v9 = vpop.xlane.xlu0 %179 }
  0xa5   : > { %v182_v11 = vmul.f32 0.00390625, %v180_v9 }
  0xa7   : > { %v462_v12 = vpack.c.bf16 %v182_v11, %v181_v10 }
  0xa9   : > { %463 = vmatpush3.bf16.msra.mxu0 %v462_v12 }
  0xac   : > { %454 = vmatmul.mubr.msk.f32.vlgmr.msra.gmra.mrb[0].mxu0 %vm186_vm1, %v183_v13 }
 0x17f   : > { %v256_v15 = vpop.f32.mrb[0].mxu0 }
 0x180   : > { %v260_v16 = vmax.f32 %v256_v15, 0.0  ;;  %v455_v17 = vpop.f32.mrb[1].mxu0 }
 0x182   : > { %456 = vmatprep.subr.msk.mxu1 %vm268_vm3, %v260_v16 }
 0x183   : > { %457 = vmatpush3.msk.msra.mxu1 %vm268_vm3, %v260_v16 }
 0x184   : > { %459 = vmatmul.mubr.msk.f32.vlgmr.msra.gmra.mrb[0].mxu1 %vm261_vm2, %v185_v18 }
 0x257   : > { %v460_v20 = vpop.f32.mrb[0].mxu1 }
 0x258   : > { %v344_v21 = vadd.f32 3.0, %v460_v20  ;;  %v338_v22 = vpop.f32.mrb[1].mxu1 }
 0x259   : > { %v339_v23 = vadd.f32 3.0, %v338_v22 }
 0x25a   : > { %v348_v24 = vmax.f32 %v344_v21, 0.0 }
 0x25b   : > { %v347_v25 = vmax.f32 %v339_v23, 0.0 }
 0x25c   : > { %v350_v27 = vmin.f32 %v348_v24, 6.0 }
 0x25d   : > { %v349_v26 = vmin.f32 %v347_v25, 6.0 }
 0x25e   : > { %v352_v29 = vmul.f32 0.16666667, %v350_v27 }
 0x25f   : > { %v351_v28 = vmul.f32 0.16666667, %v349_v26 }
 0x261   : > { %355 = vperm.xlu1 %476, %v351_v28  }
 0x265   : > { %360 = vperm.xlu1 %476, %v352_v29  }
 0x2e0   : > { %v356_v30 = vpop.permute.xlu1 %355 }
 0x2e1   : > { %v363_v31 = vmul.f32 %v356_v30, %v171_v0  ;;  %v364_v32 = vmul.f32 %v356_v30, %v172_v1 }
 0x2e3   : > { %367 = vst [vmem:[%s170_s26] sm:$0xff] %v363_v31  ;;  %368 = vst [vmem:[%s170_s26 + $0x8] sm:$0xff] %v364_v32 }
 0x2e4   : > { %v361_v33 = vpop.permute.xlu1 %360 }
 0x2e5   : > { %v365_v34 = vmul.f32 %v361_v33, %v173_v2  ;;  %v366_v35 = vmul.f32 %v361_v33, %v174_v4 }
 0x2e7   : > { %369 = vst [vmem:[%s170_s26 + $0x10] sm:$0xff] %v365_v34  ;;  %370 = vst [vmem:[%s170_s26 + $0x18] sm:$0xff] %v366_v35 }
 0x2e8 PF: > { %s13_s12 = sadd.s32 1, %s484_s12  }
 0x2e9   : > { %p10_p4 = scmp.ge.s32.totalorder %s13_s12, 4  }
 0x2eb   :  { %12 = sbr.rel (!%p10_p4) target bundleno = 1 (0x1), region = 62 }

</bundles_post_ra>
